<compile_context>
chip_gen: v5e
topology: v5e:2x2
jax: 0.10.0
libtpu: 0.0.40
codegen_flags: <defaults>
</compile_context>

<pallas_src>
import math
import functools

import jax
import jax.numpy as jnp
from jax.experimental import pallas as pl
from jax.experimental.pallas import tpu as pltpu


def _round_up(x, m):
    return ((x + m - 1) // m) * m


def _fused_mlp_kernel(*refs, num_layers, sigmoid_output, widths):
    """Whole MLP on one M-tile; activations never leave VMEM.

    refs = (x_ref, w_0..w_{L-1}, b_0..b_{L-1}, o_ref, act_ref)
      x_ref:   (tm, widths[0])          f32   input tile (true input_dim, unpadded)
      w_l:     (widths[l], widths[l+1]) bf16  pre-transposed, zero-padded weights
      b_l:     (1, widths[l+1])         f32   zero-padded bias
      o_ref:   (tm, widths[-1])         f32   lane-dense output tile
      act_ref: (tm, max hidden width)   bf16  running-activation scratch
    """
    x_ref = refs[0]
    w_refs = refs[1:1 + num_layers]
    b_refs = refs[1 + num_layers:1 + 2 * num_layers]
    o_ref = refs[1 + 2 * num_layers]
    act_ref = refs[2 + 2 * num_layers]

    for l in range(num_layers):
        if l == 0:
            act = x_ref[...].astype(jnp.bfloat16)
        else:
            act = act_ref[:, :widths[l]]
        # bf16 MXU inputs, f32 accumulation; epilogue (bias/relu/sigmoid) in f32.
        acc = jnp.dot(act, w_refs[l][...], preferred_element_type=jnp.float32)
        acc = acc + b_refs[l][...]
        if l < num_layers - 1:
            act_ref[:, :widths[l + 1]] = jnp.maximum(acc, 0.0).astype(jnp.bfloat16)
        else:
            if sigmoid_output:
                acc = jax.nn.sigmoid(acc)
            o_ref[...] = acc.astype(o_ref.dtype)


def init_mlp_params(key, input_dim, hidden_dim, output_dim, num_layers):
    """PyTorch nn.Linear-style params: (W (out,in), b (out,)) per layer, f32."""
    h = [hidden_dim] * (num_layers - 1)
    in_dims = [input_dim] + h
    out_dims = h + [output_dim]
    params = []
    for n_in, n_out in zip(in_dims, out_dims):
        key, kw, kb = jax.random.split(key, 3)
        bound = 1.0 / math.sqrt(n_in)
        w = jax.random.uniform(kw, (n_out, n_in), jnp.float32, -bound, bound)
        b = jax.random.uniform(kb, (n_out,), jnp.float32, -bound, bound)
        params.append((w, b))
    return params


def pack_mlp_params(params, input_dim):
    """One-time repack (do NOT call per forward): transpose each W to (K, N),
    zero-pad each layer's OUTPUT features (and hence the next layer's input
    features) to a lane-dense multiple of 128, cast weights to bf16 (biases
    stay f32).  widths[0] = true input_dim so x never needs a feature pad."""
    widths = [input_dim] + [_round_up(w.shape[0], 128) for (w, _) in params]
    w_list, b_list = [], []
    for l, (w, b) in enumerate(params):
        n_out, n_in = w.shape
        k_pad, n_pad = widths[l], widths[l + 1]
        w_p = jnp.zeros((k_pad, n_pad), jnp.float32).at[:n_in, :n_out].set(w.T)
        b_p = jnp.zeros((1, n_pad), jnp.float32).at[0, :n_out].set(b)
        w_list.append(w_p.astype(jnp.bfloat16))
        b_list.append(b_p)
    return w_list, b_list, tuple(widths)


def _resident_spec(shape):
    """Constant-index operand kept resident in VMEM; single-buffered because the
    block index never changes across the grid."""
    index_map = lambda i: (0,) * len(shape)
    try:
        return pl.BlockSpec(shape, index_map, pipeline_mode=pl.Buffered(1))
    except TypeError:  # older jax without pipeline_mode kwarg
        return pl.BlockSpec(shape, index_map)


def mlp_forward(x, w_list, b_list, widths, output_dim, sigmoid_output=False):
    """Equivalent of MLP.forward: relu on all but last layer, optional sigmoid."""
    orig_shape = x.shape
    x2d = x.reshape(-1, orig_shape[-1]).astype(jnp.float32)
    M, K = x2d.shape
    L = len(w_list)
    n_out_pad = widths[-1]
    scratch_w = max(widths[1:L]) if L > 1 else 128

    # Generation-aware VMEM budget + explicit limit (v5e/v6e: 128 MiB physical,
    # v7x: 64 MiB per TensorCore).
    try:
        cap = int(pltpu.get_tpu_info().vmem_capacity_bytes)
        if cap <= 0:
            raise ValueError(cap)
    except Exception:
        cap = 64 << 20  # conservative (v7x-sized) fallback
    budget = max(min((cap * 3) // 4, cap - (16 << 20)), 8 << 20)

    w_bytes = sum(int(w.size) * 2 for w in w_list)   # bf16, single-buffered
    b_bytes = sum(int(b.size) * 4 for b in b_list)   # f32,  single-buffered

    def vmem_need(tm):
        return (2 * tm * K * 4                # double-buffered input tiles
                + 2 * tm * n_out_pad * 4      # double-buffered output tiles
                + w_bytes + b_bytes           # resident weights / biases
                + tm * scratch_w * 2)         # bf16 activation scratch

    # TODO(synk): if the resident weights ever exceed `budget` (very large
    # L*D*D, esp. on v7x's 64 MiB VMEM), add a per-layer weight-streaming grid
    # axis (weight block (1,D,D), pl.when-gated epilogue). For this module's
    # dims the resident path always fits.

    # Pick the largest M-tile that fits the budget, then pad M up to it
    # (instead of requiring tm to divide a pre-chosen m_pad).
    tm = 8
    for cand in (2048, 1024, 512, 256, 128, 64, 32, 16, 8):
        if vmem_need(cand) <= budget:
            tm = cand
            break
    tm = min(tm, _round_up(max(M, 8), 8))     # don't over-tile tiny M
    m_pad = _round_up(max(M, 8), tm)
    x_p = x2d if m_pad == M else jnp.pad(x2d, ((0, m_pad - M), (0, 0)))

    need = vmem_need(tm)
    vmem_limit = int(min(cap, max(2 * need + (8 << 20), 32 << 20)))

    flops = 2 * m_pad * sum(int(w.shape[0]) * int(w.shape[1]) for w in w_list)
    transcendentals = m_pad * n_out_pad if sigmoid_output else 0
    bytes_accessed = (int(x_p.size) * 4 + w_bytes + b_bytes
                      + m_pad * n_out_pad * 4)

    kernel = functools.partial(_fused_mlp_kernel, num_layers=L,
                               sigmoid_output=sigmoid_output, widths=widths)

    in_specs = [pl.BlockSpec((tm, K), lambda i: (i, 0))]
    in_specs += [_resident_spec(tuple(w.shape)) for w in w_list]
    in_specs += [_resident_spec(tuple(b.shape)) for b in b_list]

    out_p = pl.pallas_call(
        kernel,
        out_shape=jax.ShapeDtypeStruct((m_pad, n_out_pad), jnp.float32),
        grid=(m_pad // tm,),
        in_specs=in_specs,
        out_specs=pl.BlockSpec((tm, n_out_pad), lambda i: (i, 0)),
        scratch_shapes=[pltpu.VMEM((tm, scratch_w), jnp.bfloat16)],
        compiler_params=pltpu.CompilerParams(
            dimension_semantics=("parallel",),
            vmem_limit_bytes=vmem_limit),
        cost_estimate=pl.CostEstimate(
            flops=flops, transcendentals=transcendentals,
            bytes_accessed=bytes_accessed),
    )(x_p, *w_list, *b_list)

    out = out_p[:M, :output_dim]
    return out.reshape(*orig_shape[:-1], output_dim)


def mlp_reference(x, params, sigmoid_output=False):
    num_layers = len(params)
    for i, (w, b) in enumerate(params):
        x = x @ w.T + b
        if i < num_layers - 1:
            x = jnp.maximum(x, 0.0)
    if sigmoid_output:
        x = jax.nn.sigmoid(x)
    return x


if __name__ == "__main__":
    key = jax.random.PRNGKey(0)
    k_in, k_params = jax.random.split(key)

    # Small shapes consistent with the module: tokens (batch=2, seq=8) of dim 32.
    batch, seq = 2, 8
    input_dim, hidden_dim, output_dim, num_layers = 32, 64, 16, 3
    sigmoid_output = True

    x = jax.random.normal(k_in, (batch, seq, input_dim), jnp.float32)
    params = init_mlp_params(k_params, input_dim, hidden_dim, output_dim,
                             num_layers)
    # One-time packing (transpose + per-layer pad + bf16) outside the forward path.
    w_list, b_list, widths = pack_mlp_params(params, input_dim)

    out = mlp_forward(x, w_list, b_list, widths, output_dim,
                      sigmoid_output=sigmoid_output)
    out = jax.block_until_ready(out)

    ref = mlp_reference(x, params, sigmoid_output=sigmoid_output)
    assert out.shape == (batch, seq, output_dim), out.shape
    # bf16 MXU inputs / bf16 inter-layer activations with f32 accumulation
    # -> loosened tolerance vs the f32 reference (inference-grade).
    err = float(jnp.max(jnp.abs(out - ref)))
    assert jnp.allclose(out, ref, atol=2e-2, rtol=0), err

    print("KERNEL_OK")
</pallas_src>

<mosaic_0001>
module attributes {stable_mosaic.version = 11 : i64} {
  func.func @_fused_mlp_kernel(%arg0: i32, %arg1: memref<16x32xf32, #tpu.memory_space<vmem>>, %arg2: memref<32x128xbf16, #tpu.memory_space<vmem>>, %arg3: memref<128x128xbf16, #tpu.memory_space<vmem>>, %arg4: memref<128x128xbf16, #tpu.memory_space<vmem>>, %arg5: memref<1x128xf32, #tpu.memory_space<vmem>>, %arg6: memref<1x128xf32, #tpu.memory_space<vmem>>, %arg7: memref<1x128xf32, #tpu.memory_space<vmem>>, %arg8: memref<16x128xf32, #tpu.memory_space<vmem>>, %arg9: memref<16x128xbf16, #tpu.memory_space<vmem>>) attributes {dimension_semantics = [#tpu.dimension_semantics<parallel>], iteration_bounds = array<i64: 1>, scalar_prefetch = 0 : i64, scratch_operands = 1 : i64, tpu.core_type = #tpu.core_type<tc>, window_params = [{transform_indices = @transform_0, window_bounds = array<i64: 16, 32>}, {pipeline_mode = #tpu.pipeline_mode<synchronous>, transform_indices = @transform_1, window_bounds = array<i64: 32, 128>}, {pipeline_mode = #tpu.pipeline_mode<synchronous>, transform_indices = @transform_2, window_bounds = array<i64: 128, 128>}, {pipeline_mode = #tpu.pipeline_mode<synchronous>, transform_indices = @transform_3, window_bounds = array<i64: 128, 128>}, {pipeline_mode = #tpu.pipeline_mode<synchronous>, transform_indices = @transform_4, window_bounds = array<i64: 1, 128>}, {pipeline_mode = #tpu.pipeline_mode<synchronous>, transform_indices = @transform_5, window_bounds = array<i64: 1, 128>}, {pipeline_mode = #tpu.pipeline_mode<synchronous>, transform_indices = @transform_6, window_bounds = array<i64: 1, 128>}, {transform_indices = @transform_7, window_bounds = array<i64: 16, 128>}]} {
    %c0 = arith.constant 0 : index
    %c0_0 = arith.constant 0 : index
    %0 = vector.load %arg1[%c0, %c0_0] : memref<16x32xf32, #tpu.memory_space<vmem>>, vector<16x32xf32>
    %1 = arith.truncf %0 : vector<16x32xf32> to vector<16x32xbf16>
    %c0_1 = arith.constant 0 : index
    %c0_2 = arith.constant 0 : index
    %2 = vector.load %arg2[%c0_1, %c0_2] : memref<32x128xbf16, #tpu.memory_space<vmem>>, vector<32x128xbf16>
    %cst = arith.constant dense<0.000000e+00> : vector<16x128xf32>
    %3 = tpu.matmul %1, %2, %cst {dimension_numbers = #tpu.dot_dimension_numbers<[1], [0], [0], [1], [0, 0, 1, 1], [], []>} : vector<16x32xbf16>, vector<32x128xbf16>, vector<16x128xf32> -> vector<16x128xf32>
    %c0_3 = arith.constant 0 : index
    %c0_4 = arith.constant 0 : index
    %4 = vector.load %arg5[%c0_3, %c0_4] : memref<1x128xf32, #tpu.memory_space<vmem>>, vector<1x128xf32>
    %5 = vector.broadcast %4 : vector<1x128xf32> to vector<16x128xf32>
    %6 = arith.addf %3, %5 : vector<16x128xf32>
    %cst_5 = arith.constant 0.000000e+00 : f32
    %7 = vector.broadcast %cst_5 : f32 to vector<16x128xf32>
    %8 = arith.maximumf %6, %7 : vector<16x128xf32>
    %9 = arith.truncf %8 : vector<16x128xf32> to vector<16x128xbf16>
    %c0_6 = arith.constant 0 : index
    %c0_7 = arith.constant 0 : index
    %10 = vector.load %arg9[%c0_6, %c0_7] : memref<16x128xbf16, #tpu.memory_space<vmem>>, vector<16x128xbf16>
    tpu.vector_store %arg9[%c0_6, %c0_7], %9 {strides = array<i32>} : memref<16x128xbf16, #tpu.memory_space<vmem>>, vector<16x128xbf16>,
    %c0_8 = arith.constant 0 : index
    %c0_9 = arith.constant 0 : index
    %11 = vector.load %arg9[%c0_8, %c0_9] : memref<16x128xbf16, #tpu.memory_space<vmem>>, vector<16x128xbf16>
    %c0_10 = arith.constant 0 : index
    %c0_11 = arith.constant 0 : index
    %12 = vector.load %arg3[%c0_10, %c0_11] : memref<128x128xbf16, #tpu.memory_space<vmem>>, vector<128x128xbf16>
    %cst_12 = arith.constant dense<0.000000e+00> : vector<16x128xf32>
    %13 = tpu.matmul %11, %12, %cst_12 {dimension_numbers = #tpu.dot_dimension_numbers<[1], [0], [0], [1], [0, 0, 1, 1], [], []>} : vector<16x128xbf16>, vector<128x128xbf16>, vector<16x128xf32> -> vector<16x128xf32>
    %c0_13 = arith.constant 0 : index
    %c0_14 = arith.constant 0 : index
    %14 = vector.load %arg6[%c0_13, %c0_14] : memref<1x128xf32, #tpu.memory_space<vmem>>, vector<1x128xf32>
    %15 = vector.broadcast %14 : vector<1x128xf32> to vector<16x128xf32>
    %16 = arith.addf %13, %15 : vector<16x128xf32>
    %cst_15 = arith.constant 0.000000e+00 : f32
    %17 = vector.broadcast %cst_15 : f32 to vector<16x128xf32>
    %18 = arith.maximumf %16, %17 : vector<16x128xf32>
    %19 = arith.truncf %18 : vector<16x128xf32> to vector<16x128xbf16>
    %c0_16 = arith.constant 0 : index
    %c0_17 = arith.constant 0 : index
    %20 = vector.load %arg9[%c0_16, %c0_17] : memref<16x128xbf16, #tpu.memory_space<vmem>>, vector<16x128xbf16>
    tpu.vector_store %arg9[%c0_16, %c0_17], %19 {strides = array<i32>} : memref<16x128xbf16, #tpu.memory_space<vmem>>, vector<16x128xbf16>,
    %c0_18 = arith.constant 0 : index
    %c0_19 = arith.constant 0 : index
    %21 = vector.load %arg9[%c0_18, %c0_19] : memref<16x128xbf16, #tpu.memory_space<vmem>>, vector<16x128xbf16>
    %c0_20 = arith.constant 0 : index
    %c0_21 = arith.constant 0 : index
    %22 = vector.load %arg4[%c0_20, %c0_21] : memref<128x128xbf16, #tpu.memory_space<vmem>>, vector<128x128xbf16>
    %cst_22 = arith.constant dense<0.000000e+00> : vector<16x128xf32>
    %23 = tpu.matmul %21, %22, %cst_22 {dimension_numbers = #tpu.dot_dimension_numbers<[1], [0], [0], [1], [0, 0, 1, 1], [], []>} : vector<16x128xbf16>, vector<128x128xbf16>, vector<16x128xf32> -> vector<16x128xf32>
    %c0_23 = arith.constant 0 : index
    %c0_24 = arith.constant 0 : index
    %24 = vector.load %arg7[%c0_23, %c0_24] : memref<1x128xf32, #tpu.memory_space<vmem>>, vector<1x128xf32>
    %25 = vector.broadcast %24 : vector<1x128xf32> to vector<16x128xf32>
    %26 = arith.addf %23, %25 : vector<16x128xf32>
    %27 = arith.negf %26 : vector<16x128xf32>
    %28 = math.exp %27 : vector<16x128xf32>
    %cst_25 = arith.constant 1.000000e+00 : f32
    %29 = vector.broadcast %cst_25 : f32 to vector<16x128xf32>
    %30 = arith.addf %29, %28 : vector<16x128xf32>
    %31 = arith.divf %29, %30 : vector<16x128xf32>
    %c0_26 = arith.constant 0 : index
    %c0_27 = arith.constant 0 : index
    %32 = vector.load %arg8[%c0_26, %c0_27] : memref<16x128xf32, #tpu.memory_space<vmem>>, vector<16x128xf32>
    tpu.vector_store %arg8[%c0_26, %c0_27], %31 {strides = array<i32>} : memref<16x128xf32, #tpu.memory_space<vmem>>, vector<16x128xf32>,
    return
  }
  func.func @transform_0(%arg0: i32) -> (i32, i32) {
    %c0_i32 = arith.constant 0 : i32
    %c0_i32_0 = arith.constant 0 : i32
    return %arg0, %c0_i32 : i32, i32
  }
  func.func @transform_1(%arg0: i32) -> (i32, i32) {
    %c0_i32 = arith.constant 0 : i32
    %c0_i32_0 = arith.constant 0 : i32
    %c0_i32_1 = arith.constant 0 : i32
    return %c0_i32, %c0_i32_0 : i32, i32
  }
  func.func @transform_2(%arg0: i32) -> (i32, i32) {
    %c0_i32 = arith.constant 0 : i32
    %c0_i32_0 = arith.constant 0 : i32
    %c0_i32_1 = arith.constant 0 : i32
    return %c0_i32, %c0_i32_0 : i32, i32
  }
  func.func @transform_3(%arg0: i32) -> (i32, i32) {
    %c0_i32 = arith.constant 0 : i32
    %c0_i32_0 = arith.constant 0 : i32
    %c0_i32_1 = arith.constant 0 : i32
    return %c0_i32, %c0_i32_0 : i32, i32
  }
  func.func @transform_4(%arg0: i32) -> (i32, i32) {
    %c0_i32 = arith.constant 0 : i32
    %c0_i32_0 = arith.constant 0 : i32
    %c0_i32_1 = arith.constant 0 : i32
    return %c0_i32, %c0_i32_0 : i32, i32
  }
  func.func @transform_5(%arg0: i32) -> (i32, i32) {
    %c0_i32 = arith.constant 0 : i32
    %c0_i32_0 = arith.constant 0 : i32
    %c0_i32_1 = arith.constant 0 : i32
    return %c0_i32, %c0_i32_0 : i32, i32
  }
  func.func @transform_6(%arg0: i32) -> (i32, i32) {
    %c0_i32 = arith.constant 0 : i32
    %c0_i32_0 = arith.constant 0 : i32
    %c0_i32_1 = arith.constant 0 : i32
    return %c0_i32, %c0_i32_0 : i32, i32
  }
  func.func @transform_7(%arg0: i32) -> (i32, i32) {
    %c0_i32 = arith.constant 0 : i32
    %c0_i32_0 = arith.constant 0 : i32
    return %arg0, %c0_i32 : i32, i32
  }
}

</mosaic_0001>

<bundles_post_ra>
// kernel: tpu_custom_call.1
= control target key start
LH: loop header
LB: loop body
LE: loop exit
PB: predicated region body
PF: predicated region fallthrough
CT: control target
= control target key end

     0   :  { %12 = vsyncpa [#allocation4], 0  ;;  %s725_s0 = inlined_call_operand.hbm [shape: f32[16,32], index: 0, kind: input, shape index: {}]   ;;  %s726_s1 = inlined_call_operand.hbm [shape: bf16[32,128], index: 1, kind: input, shape index: {}]   ;;  %s727_s2 = inlined_call_operand.hbm [shape: bf16[128,128], index: 2, kind: input, shape index: {}]   ;;  %s728_s3 = inlined_call_operand.hbm [shape: bf16[128,128], index: 3, kind: input, shape index: {}]   ;;  %s729_s4 = inlined_call_operand.vmem [shape: f32[1,128], index: 4, kind: input, shape index: {}]   ;;  %s730_s5 = inlined_call_operand.vmem [shape: f32[1,128], index: 5, kind: input, shape index: {}]   ;;  %s731_s6 = inlined_call_operand.vmem [shape: f32[1,128], index: 6, kind: input, shape index: {}]   ;;  %s732_s7 = inlined_call_operand.hbm [shape: f32[16,128], index: 7, kind: output, shape index: {}]  }
   0x1   :  { %13 = vsyncpa [#allocation7], 0 }
   0x2   :  { %14 = vsyncpa [#allocation10], 0  ;;  %s33_s26 = sshll.u32 %s726_s1, 4  ;;  %s34_s26 = int_to_ptr.hbm [resolvable:$true] %s33_s26 }
   0x3   :  { %15 = vsyncpa [#allocation5], 0  ;;  %s646_s27 = smov [#allocation6]   ;;  %s20_s8 = sshll.u32 %s725_s0, 4  ;;  %s21_s8 = int_to_ptr.hbm [resolvable:$true] %s20_s8 }
   0x4   :  { %s35_s28 = sshll.u32 %s646_s27, 4  ;;  %s647_s9 = smov 64   ;;  %s36_s28 = int_to_ptr.vmem [resolvable:$true] %s35_s28 }
   0x5   :  { %s648_s10 = smov 4   ;;  %s649_s11 = smov [#allocation3]  }
   0x6   :  { %41 = dma.hbm_to_vmem [thread:$0]  %s34_s26, 256, %s36_s28, [#allocation7], %s647_s9, %s647_s9, %s648_s10  }
   0x7   :  { %s22_s12 = sshll.u32 %s649_s11, 4  ;;  %s650_s13 = smov 128   ;;  %s23_s12 = int_to_ptr.vmem [resolvable:$true] %s22_s12 }
   0x8   :  { %s651_s14 = smov 8   ;;  %s46_s16 = sshll.u32 %s727_s2, 4  ;;  %s47_s16 = int_to_ptr.hbm [resolvable:$true] %s46_s16 }
   0x9   :  { %28 = dma.hbm_to_vmem [thread:$0]  %s21_s8, 256, %s23_s12, [#allocation4], %s650_s13, %s650_s13, %s651_s14  }
   0xa   :  { %s652_s17 = smov [#allocation8]   ;;  %s59_s20 = sshll.u32 %s728_s3, 4  ;;  %s60_s20 = int_to_ptr.hbm [resolvable:$true] %s59_s20 }
   0xb   :  { %s48_s0 = sshll.u32 %s652_s17, 4  ;;  %s653_s21 = smov [#allocation9]   ;;  %s49_s0 = int_to_ptr.vmem [resolvable:$true] %s48_s0 }
   0xc   :  { %54 = dma.hbm_to_vmem [thread:$0]  %s47_s16, 1024, %s49_s0, [#allocation7], %s647_s9, %s647_s9, %s648_s10  }
   0xd   :  { %s61_s22 = sshll.u32 %s653_s21, 4  ;;  %s62_s22 = int_to_ptr.vmem [resolvable:$true] %s61_s22 }
   0xe   :  { %67 = dma.hbm_to_vmem [thread:$0]  %s60_s20, 1024, %s62_s22, [#allocation10], %s647_s9, %s647_s9, %s648_s10  }
   0xf   :  { %638 = dma.done.wait [#allocation4], 256  }
  0x10   :  { %639 = vsyncadd [#allocation4], 4294967040 }
  0x11   :  { %640 = dma.done.wait [#allocation7], 1280  }
  0x12   :  { %641 = vsyncadd [#allocation7], 4294966016 }
  0x13   :  { %642 = dma.done.wait [#allocation10], 1024  }
  0x14   :  { %643 = vsyncadd [#allocation10], 4294966272  ;;  %v469_v0 = vld [vmem:[#allocation6 + $0x8] sm:$0xff]  ;;  %v468_v1 = vld [vmem:[#allocation6] sm:$0xff]  ;;  %vm114_vm0 = vcmask 261120   ;;  %s370_s28 = sshll.u32 %s732_s7, 4  ;;  %s371_s28 = int_to_ptr.hbm [resolvable:$true] %s370_s28 }
  0x15   :  { %v91_v2 = vld [vmem:[#allocation3] sm:$0xff]  ;;  %v478_v3 = vld [vmem:[#allocation8 + $0x38] sm:$0xff]  ;;  %124 = vmatpush.bf16.msra.mxu0 %v469_v0  ;;  %v92_v4 = vld [vmem:[#allocation3 + $0x8] sm:$0xff] }
  0x16   :  { %214 = vmatpush.bf16.msra.mxu1 %v478_v3  ;;  %v477_v5 = vld [vmem:[#allocation8 + $0x30] sm:$0xff]  ;;  %v93_v6 = vpack.c.bf16 %v92_v4, %v91_v2  ;;  %v476_v7 = vld [vmem:[#allocation8 + $0x28] sm:$0xff]  ;;  %v475_v8 = vld [vmem:[#allocation8 + $0x20] sm:$0xff] }
  0x17   :  { %v474_v9 = vld [vmem:[#allocation8 + $0x18] sm:$0xff]  ;;  %v473_v10 = vld [vmem:[#allocation8 + $0x10] sm:$0xff]  ;;  %v472_v11 = vld [vmem:[#allocation8 + $0x8] sm:$0xff] }
  0x18   :  { %v471_v12 = vld [vmem:[#allocation8] sm:$0xff]  ;;  %v487_v13 = vld [vmem:[#allocation9 + $0x38] sm:$0xff]  ;;  %v486_v14 = vld [vmem:[#allocation9 + $0x30] sm:$0xff] }
  0x19   :  { %125 = vmatpush.bf16.msra.mxu0 %v468_v1  ;;  %310 = vmatpush.bf16.msra.mxu2 %v487_v13  ;;  %v507_v16 = vld [vmem:[%s729_s4] ss:$0 sm:$0xff]  ;;  %v485_v24 = vld [vmem:[#allocation9 + $0x28] sm:$0xff]  ;;  %v484_v25 = vld [vmem:[#allocation9 + $0x20] sm:$0xff] }
  0x1a   :  { %215 = vmatpush.bf16.msra.mxu1 %v477_v5  ;;  %v483_v26 = vld [vmem:[#allocation9 + $0x18] sm:$0xff]  ;;  %v482_v27 = vld [vmem:[#allocation9 + $0x10] sm:$0xff]  ;;  %v481_v28 = vld [vmem:[#allocation9 + $0x8] sm:$0xff] }
  0x1b   :  { %v480_v29 = vld [vmem:[#allocation9] sm:$0xff]  ;;  %v508_v31 = vld [vmem:[%s730_s5] ss:$0 sm:$0xff]  ;;  %s654_s5 = smov [#allocation11]  }
  0x1c   :  { %393 = vmatmul.msk.bf16.vlgmr.msra.gmra.mxu0 %vm114_vm0, %v93_v6  ;;  %v509_v39 = vld [vmem:[%s731_s6] ss:$0 sm:$0xff]  ;;  %s368_s6 = sshll.u32 %s654_s5, 4  ;;  %s369_s6 = int_to_ptr.vmem [resolvable:$true] %s368_s6 }
  0x1d   :  { %311 = vmatpush.bf16.msra.mxu2 %v486_v14 }
  0x1e   :  { %216 = vmatpush.bf16.msra.mxu1 %v476_v7 }
  0x21   :  { %312 = vmatpush.bf16.msra.mxu2 %v485_v24 }
  0x22   :  { %217 = vmatpush.bf16.msra.mxu1 %v475_v8 }
  0x25   :  { %313 = vmatpush.bf16.msra.mxu2 %v484_v25 }
  0x26   :  { %218 = vmatpush.bf16.msra.mxu1 %v474_v9 }
  0x29   :  { %314 = vmatpush.bf16.msra.mxu2 %v483_v26 }
  0x2a   :  { %219 = vmatpush.bf16.msra.mxu1 %v473_v10 }
  0x2d   :  { %315 = vmatpush.bf16.msra.mxu2 %v482_v27 }
  0x2e   :  { %220 = vmatpush.bf16.msra.mxu1 %v472_v11 }
  0x31   :  { %316 = vmatpush.bf16.msra.mxu2 %v481_v28 }
  0x32   :  { %221 = vmatpush.bf16.msra.mxu1 %v471_v12 }
  0x35   :  { %317 = vmatpush.bf16.msra.mxu2 %v480_v29 }
  0x99   :  { %v127_v15 = vpop.f32.mrf.mxu0 }
  0x9a   :  { %v128_v17 = vadd.f32 %v507_v16, %v127_v15 }
  0x9c   :  { %v132_v20 = vmax.f32 %v128_v17, 0.0 }
  0xa1   :  { %v129_v18 = vpop.f32.mrf.mxu0 }
  0xa2   :  { %v130_v19 = vadd.f32 %v507_v16, %v129_v18 }
  0xa4   :  { %v133_v21 = vmax.f32 %v130_v19, 0.0 }
  0xa6   :  { %v491_v22 = vpack.c.bf16 %v133_v21, %v132_v20 }
  0xa8   :  { %492 = vst [vmem:[#allocation2] sm:$0xff] %v491_v22  }
  0xaf   :  { %v470_v23 = vld [vmem:[#allocation2] sm:$0xff] }
  0xb0   :  { %222 = vmatmul.bf16.vlgmr.msra.gmra.mxu1 %v470_v23 }
 0x12d   :  { %v223_v30 = vpop.f32.mrf.mxu1 }
 0x12e   :  { %v224_v32 = vadd.f32 %v508_v31, %v223_v30 }
 0x130   :  { %v228_v35 = vmax.f32 %v224_v32, 0.0 }
 0x135   :  { %v225_v33 = vpop.f32.mrf.mxu1 }
 0x136   :  { %v226_v34 = vadd.f32 %v508_v31, %v225_v33 }
 0x138   :  { %v229_v36 = vmax.f32 %v226_v34, 0.0 }
 0x13a   :  { %v496_v37 = vpack.c.bf16 %v229_v36, %v228_v35 }
 0x13c   :  { %497 = vst [vmem:[#allocation2] sm:$0xff] %v496_v37  }
 0x143   :  { %v479_v38 = vld [vmem:[#allocation2] sm:$0xff] }
 0x144   :  { %318 = vmatmul.bf16.vlgmr.msra.gmra.mxu2 %v479_v38 }
 0x1c7   :  { %v319_v40 = vpop.f32.mrf.mxu2 }
 0x1c8   :  { %v320_v41 = vadd.f32 %v509_v39, %v319_v40 }
 0x1ca   :  { %v466_v42 = vmul.f32 -1.442695, %v320_v41 }
 0x1cc   :  { %510 = vpow2.f32 %v466_v42 }
 0x1cf   :  { %v321_v43 = vpop.f32.mrf.mxu2 }
 0x1d0   :  { %v322_v44 = vadd.f32 %v509_v39, %v321_v43 }
 0x1d2   :  { %v511_v45 = vpop.eup %510  ;;  %v467_v46 = vmul.f32 -1.442695, %v322_v44 }
 0x1d3   :  { %v330_v47 = vadd.f32 1.0, %v511_v45 }
 0x1d4   :  { %512 = vpow2.f32 %v467_v46 }
 0x1d5   :  { %514 = vrcp.f32 %v330_v47  ;;  %v343_v53 = vand.u32 2147483648, %v330_v47  ;;  %v341_v55 = vand.u32 2147483647, %v330_v47  ;;  %vm337_vm2 = vweird.f32 %v330_v47 }
 0x1d7   :  { %v344_v58 = vor.u32 1.1754944e-38, %v343_v53  ;;  %vm342_vm4 = vcmp.eq.f32.partialorder %v341_v55, 8.507059e+37 }
 0x1da   :  { %v513_v48 = vpop.eup %512 }
 0x1db   :  { %v515_v49 = vpop.eup %514  ;;  %v331_v50 = vadd.f32 1.0, %v513_v48 }
 0x1dc   :  { %v333_v51 = vmul.f32 %v515_v49, %v330_v47  ;;  %vm338_vm1 = vweird.f32 %v515_v49 }
 0x1dd   :  { %516 = vrcp.f32 %v331_v50  ;;  %vm339_vm3 = vmor %vm337_vm2, %vm338_vm1  ;;  %v358_v63 = vand.u32 2147483648, %v331_v50  ;;  %v356_v1 = vand.u32 2147483647, %v331_v50  ;;  %vm352_vm6 = vweird.f32 %v331_v50 }
 0x1de   :  { %v334_v52 = vsub.f32 1.0, %v333_v51 }
 0x1df   :  { %v359_v3 = vor.u32 1.1754944e-38, %v358_v63  ;;  %vm357_vm8 = vcmp.eq.f32.partialorder %v356_v1, 8.507059e+37 }
 0x1e0   :  { %v335_v54 = vmul.f32 %v515_v49, %v334_v52 }
 0x1e2   :  { %v336_v56 = vadd.f32 %v515_v49, %v335_v54 }
 0x1e3   :  { %v517_v57 = vpop.eup %516 }
 0x1e4   :  { %v348_v59 = vmul.f32 %v517_v57, %v331_v50  ;;  %v340_v60 = vsel %vm339_vm3, %v515_v49, %v336_v56  ;;  %vm353_vm5 = vweird.f32 %v517_v57 }
 0x1e5   :  { %v345_v61 = vsel %vm342_vm4, %v344_v58, %v340_v60  ;;  %vm354_vm7 = vmor %vm352_vm6, %vm353_vm5 }
 0x1e6   :  { %v349_v62 = vsub.f32 1.0, %v348_v59  ;;  %362 = vst [vmem:[#allocation11] sm:$0xff] %v345_v61 }
 0x1e8   :  { %v350_v0 = vmul.f32 %v517_v57, %v349_v62 }
 0x1ea   :  { %v351_v2 = vadd.f32 %v517_v57, %v350_v0 }
 0x1ec   :  { %v355_v4 = vsel %vm354_vm7, %v517_v57, %v351_v2 }
 0x1ed   :  { %v360_v5 = vsel %vm357_vm8, %v359_v3, %v355_v4 }
 0x1ee   :  { %363 = vst [vmem:[#allocation11 + $0x8] sm:$0xff] %v360_v5 }
 0x1ef   :  { %376 = dma.vmem_to_hbm [thread:$0]  %s369_s6, 256, %s371_s28, [#allocation5], %s650_s13, %s650_s13, %s651_s14  }
 0x1f0   :  { %644 = dma.done.wait [#allocation5], 256  }
 0x1f1   :  { %645 = vsyncadd [#allocation5], 4294967040 }
 0x1f2   :  { %381 = vsyncpa [#allocation4], 1 }
 0x1f3   :  { %382 = vsyncpa [#allocation7], 1 }
 0x1f4   :  { %383 = vsyncpa [#allocation10], 1 }
 0x1f5   :  { %384 = vsyncpa [#allocation5], 1 }

</bundles_post_ra>
